<compile_context>
chip_gen: v7x
topology: tpu7x:2x2x1
jax: 0.10.0
libtpu: 0.0.40
codegen_flags: <defaults>
</compile_context>

<pallas_src>
import functools

import jax
import jax.numpy as jnp
from jax.experimental import pallas as pl
from jax.experimental.pallas import tpu as pltpu


def _gaussian_smearing_kernel(dist_ref, offset_ref, out_ref, *, coeff):
    # dist_ref:   (TILE_N, 1) f32  distances on the sublane axis
    # offset_ref: (1, G)      f32  gaussian centers on the lane axis (resident)
    # out_ref:    (TILE_N, G)      output block, already in the final [N, G] layout
    d = dist_ref[...]                     # (TILE_N, 1)
    off = offset_ref[...]                 # (1, G)
    diff = d - off                        # (TILE_N, G), broadcast both ways, f32 math
    out_ref[...] = jnp.exp(coeff * (diff * diff)).astype(out_ref.dtype)


def gaussian_smearing(dist, *, start=0.0, stop=10.0, num_gaussians=50,
                      tile_n=8192, out_dtype=jnp.float32):
    """Expand distances [N] into gaussian basis functions [N, num_gaussians]."""
    if num_gaussians < 2:
        raise ValueError("num_gaussians must be >= 2 (as in the PyTorch module).")
    dist = jnp.asarray(dist, jnp.float32).reshape(-1)
    n = int(dist.shape[0])
    g = int(num_gaussians)

    # Module __init__ constants, in pure Python (jit-safe).
    step = (float(stop) - float(start)) / (g - 1)
    coeff = -0.5 / step ** 2
    # Exact linspace centers (same buffer as the PyTorch module registers).
    offset = jnp.linspace(float(start), float(stop), g,
                          dtype=jnp.float32).reshape(1, g)

    # ---- row tiling ---------------------------------------------------------
    # Block dims must be multiples of (8, 128) or equal the full array dims.
    tile_n = max(128, int(tile_n))
    if n <= 1024:
        tn = n                                   # single block (== full dim: legal)
    elif n <= 2 * tile_n:
        # Split into exactly 2 blocks so both TensorCores get work on v7x.
        tn = (((n + 1) // 2) + 127) // 128 * 128
    else:
        tn = (tile_n // 128) * 128
    grid = (pl.cdiv(n, tn),)                     # ragged tail handled by Pallas

    out_itemsize = jnp.dtype(out_dtype).itemsize
    cost = pl.CostEstimate(
        flops=3 * n * g,                         # sub, square, scale
        transcendentals=n * g,                   # one exp per output element
        bytes_accessed=4 * n + 4 * g + out_itemsize * n * g,
    )

    kernel = functools.partial(_gaussian_smearing_kernel, coeff=coeff)
    out = pl.pallas_call(
        kernel,
        out_shape=jax.ShapeDtypeStruct((n, g), out_dtype),
        grid_spec=pltpu.PrefetchScalarGridSpec(
            num_scalar_prefetch=0,
            grid=grid,
            in_specs=[
                pl.BlockSpec((tn, 1), lambda i: (i, 0)),   # distances
                pl.BlockSpec((1, g), lambda i: (0, 0)),    # centers (resident)
            ],
            out_specs=pl.BlockSpec((tn, g), lambda i: (i, 0)),
        ),
        compiler_params=pltpu.CompilerParams(
            dimension_semantics=("parallel",),
            vmem_limit_bytes=32 * 1024 * 1024,
        ),
        cost_estimate=cost,
    )(dist.reshape(n, 1), offset)
    return out                                    # [N, G], no post-processing


def _reference(dist, *, start=0.0, stop=10.0, num_gaussians=50):
    offset = jnp.linspace(start, stop, num_gaussians, dtype=jnp.float32)
    coeff = -0.5 / float(offset[1] - offset[0]) ** 2
    d = dist.reshape(-1, 1) - offset.reshape(1, -1)
    return jnp.exp(coeff * (d * d))


if __name__ == "__main__":
    key = jax.random.PRNGKey(0)
    num_gaussians = 50
    # Two sizes: single-block path (n not a multiple of 8) and the 2-block
    # megacore path with a ragged last block.
    for n in (200, 3000):
        k = jax.random.fold_in(key, n)
        dist = jax.random.uniform(k, (n,), jnp.float32, minval=0.0, maxval=10.0)

        out = gaussian_smearing(dist, start=0.0, stop=10.0,
                                num_gaussians=num_gaussians)
        out = jax.block_until_ready(out)

        ref = _reference(dist, start=0.0, stop=10.0, num_gaussians=num_gaussians)
        assert out.shape == (n, num_gaussians)
        assert jnp.allclose(out, ref, atol=2e-5, rtol=1e-5), (
            float(jnp.max(jnp.abs(out - ref))))
    print("KERNEL_OK")
</pallas_src>

<mosaic_0001>
module attributes {stable_mosaic.version = 11 : i64} {
  func.func @_gaussian_smearing_kernel(%arg0: i32, %arg1: memref<200x1xf32, #tpu.memory_space<vmem>>, %arg2: memref<1x50xf32, #tpu.memory_space<vmem>>, %arg3: memref<200x50xf32, #tpu.memory_space<vmem>>) attributes {dimension_semantics = [#tpu.dimension_semantics<parallel>], iteration_bounds = array<i64: 1>, scalar_prefetch = 0 : i64, scratch_operands = 0 : i64, tpu.core_type = #tpu.core_type<tc>, window_params = [{transform_indices = @transform_0, window_bounds = array<i64: 200, 1>}, {pipeline_mode = #tpu.pipeline_mode<synchronous>, transform_indices = @transform_1, window_bounds = array<i64: 1, 50>}, {transform_indices = @transform_2, window_bounds = array<i64: 200, 50>}]} {
    %c0 = arith.constant 0 : index
    %c0_0 = arith.constant 0 : index
    %0 = vector.load %arg1[%c0, %c0_0] : memref<200x1xf32, #tpu.memory_space<vmem>>, vector<200x1xf32>
    %c0_1 = arith.constant 0 : index
    %c0_2 = arith.constant 0 : index
    %1 = vector.load %arg2[%c0_1, %c0_2] : memref<1x50xf32, #tpu.memory_space<vmem>>, vector<1x50xf32>
    %2 = vector.broadcast %0 : vector<200x1xf32> to vector<200x50xf32>
    %3 = vector.broadcast %1 : vector<1x50xf32> to vector<200x50xf32>
    %4 = arith.subf %2, %3 : vector<200x50xf32>
    %5 = arith.mulf %4, %4 : vector<200x50xf32>
    %cst = arith.constant -1.200500e+01 : f32
    %6 = vector.broadcast %cst : f32 to vector<200x50xf32>
    %7 = arith.mulf %6, %5 : vector<200x50xf32>
    %8 = math.exp %7 : vector<200x50xf32>
    %c0_3 = arith.constant 0 : index
    %c0_4 = arith.constant 0 : index
    %9 = vector.load %arg3[%c0_3, %c0_4] : memref<200x50xf32, #tpu.memory_space<vmem>>, vector<200x50xf32>
    tpu.vector_store %arg3[%c0_3, %c0_4], %8 {strides = array<i32>} : memref<200x50xf32, #tpu.memory_space<vmem>>, vector<200x50xf32>,
    return
  }
  func.func @transform_0(%arg0: i32) -> (i32, i32) {
    %c0_i32 = arith.constant 0 : i32
    %c0_i32_0 = arith.constant 0 : i32
    return %arg0, %c0_i32 : i32, i32
  }
  func.func @transform_1(%arg0: i32) -> (i32, i32) {
    %c0_i32 = arith.constant 0 : i32
    %c0_i32_0 = arith.constant 0 : i32
    %c0_i32_1 = arith.constant 0 : i32
    return %c0_i32, %c0_i32_0 : i32, i32
  }
  func.func @transform_2(%arg0: i32) -> (i32, i32) {
    %c0_i32 = arith.constant 0 : i32
    %c0_i32_0 = arith.constant 0 : i32
    return %arg0, %c0_i32 : i32, i32
  }
}

</mosaic_0001>

<bundles_post_ra>
// kernel: tpu_custom_call.1
= control target key start
LH: loop header
LB: loop body
LE: loop exit
PB: predicated region body
PF: predicated region fallthrough
CT: control target
= control target key end

     0   :  { %v377_v0 = vmov 0   ;;  %vm293_vm0 = vcmask 408576   ;;  %s598_s0 = inlined_call_operand.vmem [shape: f32[200,1], index: 0, kind: input, shape index: {}]   ;;  %s599_s1 = inlined_call_operand.vmem [shape: f32[1,50], index: 1, kind: input, shape index: {}]   ;;  %s600_s2 = inlined_call_operand.vmem [shape: f32[200,50], index: 2, kind: output, shape index: {}]  }
   0x1   :  { %326 = vset.pattern.permute.xlu1 %v377_v0  ;;  %325 = vset.pattern.permute.xlu0 %v377_v0  ;;  %v13_v1 = vld [vmem:[%s598_s0 + $0x10] sm:$0xff]  ;;  %v11_v2 = vld [vmem:[%s598_s0] sm:$0xff]  ;;  %v14_v3 = vld [vmem:[%s598_s0 + $0x18] sm:$0xff] }
   0x2   :  { %49 = vperm.xlu1 %326, %v13_v1   ;;  %39 = vperm.xlu0 %325, %v11_v2   ;;  %v12_v4 = vld [vmem:[%s598_s0 + $0x8] sm:$0xff]  ;;  %v15_v6 = vld [vmem:[%s598_s0 + $0x20] sm:$0xff]  ;;  %v18_v7 = vld [vmem:[%s598_s0 + $0x38] sm:$0xff] }
   0x3   :  { %v16_v5 = vld [vmem:[%s598_s0 + $0x28] sm:$0xff]  ;;  %v17_v8 = vld [vmem:[%s598_s0 + $0x30] sm:$0xff]  ;;  %v19_v10 = vld [vmem:[%s598_s0 + $0x40] sm:$0xff] }
   0x4   :  { %v20_v9 = vld [vmem:[%s598_s0 + $0x48] sm:$0xff]  ;;  %v22_v11 = vld [vmem:[%s598_s0 + $0x58] sm:$0xff]  ;;  %v21_v12 = vld [vmem:[%s598_s0 + $0x50] sm:$0xff] }
   0x5   :  { %v24_v13 = vld [vmem:[%s598_s0 + $0x68] sm:$0xff]  ;;  %v23_v14 = vld [vmem:[%s598_s0 + $0x60] sm:$0xff]  ;;  %v26_v15 = vld [vmem:[%s598_s0 + $0x78] sm:$0xff] }
   0x6   :  { %54 = vperm.xlu1 %326, %v14_v3   ;;  %44 = vperm.xlu0 %325, %v12_v4   ;;  %v25_v16 = vld [vmem:[%s598_s0 + $0x70] sm:$0xff]  ;;  %v28_v17 = vld [vmem:[%s598_s0 + $0x88] sm:$0xff]  ;;  %v27_v18 = vld [vmem:[%s598_s0 + $0x80] sm:$0xff] }
   0x7   :  { %v30_v19 = vld [vmem:[%s598_s0 + $0x98] sm:$0xff]  ;;  %v29_v20 = vld [vmem:[%s598_s0 + $0x90] sm:$0xff]  ;;  %v32_v21 = vld [vmem:[%s598_s0 + $0xa8] sm:$0xff] }
   0x8   :  { %v31_v22 = vld [vmem:[%s598_s0 + $0xa0] sm:$0xff]  ;;  %v34_v23 = vld [vmem:[%s598_s0 + $0xb8] sm:$0xff]  ;;  %v33_v24 = vld [vmem:[%s598_s0 + $0xb0] sm:$0xff] }
   0x9   :  { %v35_v25 = vld [vmem:[%s598_s0 + $0xc0] sm:$0xff] }
   0xa   :  { %64 = vperm.xlu1 %326, %v16_v5   ;;  %59 = vperm.xlu0 %325, %v15_v6   ;;  %v471_v26 = vld [vmem:[%s599_s1] ss:$0 sm:$0xff] }
   0xe   :  { %74 = vperm.xlu1 %326, %v18_v7   ;;  %69 = vperm.xlu0 %325, %v17_v8  }
  0x12   :  { %84 = vperm.xlu1 %326, %v20_v9   ;;  %79 = vperm.xlu0 %325, %v19_v10  }
  0x16   :  { %94 = vperm.xlu1 %326, %v22_v11   ;;  %89 = vperm.xlu0 %325, %v21_v12  }
  0x1a   :  { %104 = vperm.xlu1 %326, %v24_v13   ;;  %99 = vperm.xlu0 %325, %v23_v14  }
  0x1e   :  { %114 = vperm.xlu1 %326, %v26_v15   ;;  %109 = vperm.xlu0 %325, %v25_v16  }
  0x22   :  { %124 = vperm.xlu1 %326, %v28_v17   ;;  %119 = vperm.xlu0 %325, %v27_v18  }
  0x26   :  { %134 = vperm.xlu1 %326, %v30_v19   ;;  %129 = vperm.xlu0 %325, %v29_v20  }
  0x2a   :  { %144 = vperm.xlu1 %326, %v32_v21   ;;  %139 = vperm.xlu0 %325, %v31_v22  }
  0x2e   :  { %154 = vperm.xlu1 %326, %v34_v23   ;;  %149 = vperm.xlu0 %325, %v33_v24  }
  0x32   :  { %159 = vperm.xlu0 %325, %v35_v25  }
  0x81   :  { %v50_v27 = vpop.permute.xlu1 %49  ;;  %v40_v28 = vpop.permute.xlu0 %39 }
  0x82   :  { %v170_v29 = vsub.f32 %v50_v27, %v471_v26  ;;  %v168_v30 = vsub.f32 %v40_v28, %v471_v26 }
  0x84   :  { %v195_v31 = vmul.f32 %v170_v29, %v170_v29  ;;  %v193_v32 = vmul.f32 %v168_v30, %v168_v30 }
  0x85   :  { %v55_v33 = vpop.permute.xlu1 %54  ;;  %v45_v34 = vpop.permute.xlu0 %44 }
  0x86   :  { %v220_v35 = vmul.f32 -12.005, %v195_v31  ;;  %v218_v36 = vmul.f32 -12.005, %v193_v32  ;;  %v171_v37 = vsub.f32 %v55_v33, %v471_v26  ;;  %v169_v38 = vsub.f32 %v45_v34, %v471_v26 }
  0x88   :  { %v247_v39 = vmul.f32 1.442695, %v220_v35  ;;  %v243_v40 = vmul.f32 1.442695, %v218_v36  ;;  %v196_v41 = vmul.f32 %v171_v37, %v171_v37  ;;  %v194_v42 = vmul.f32 %v169_v38, %v169_v38 }
  0x89   :  { %v65_v43 = vpop.permute.xlu1 %64  ;;  %v60_v44 = vpop.permute.xlu0 %59 }
  0x8a   :  { %327 = vpow2.f32 %v247_v39  ;;  %v221_v45 = vmul.f32 -12.005, %v196_v41  ;;  %v219_v46 = vmul.f32 -12.005, %v194_v42  ;;  %v173_v47 = vsub.f32 %v65_v43, %v471_v26 }
  0x8b   :  { %329 = vpow2.f32 %v243_v40  ;;  %v172_v48 = vsub.f32 %v60_v44, %v471_v26 }
  0x8c   :  { %v249_v49 = vmul.f32 1.442695, %v221_v45  ;;  %v245_v50 = vmul.f32 1.442695, %v219_v46  ;;  %v198_v51 = vmul.f32 %v173_v47, %v173_v47 }
  0x8d   :  { %v197_v52 = vmul.f32 %v172_v48, %v172_v48  ;;  %v75_v53 = vpop.permute.xlu1 %74  ;;  %v70_v54 = vpop.permute.xlu0 %69 }
  0x8e   :  { %331 = vpow2.f32 %v249_v49  ;;  %v223_v55 = vmul.f32 -12.005, %v198_v51  ;;  %v175_v56 = vsub.f32 %v75_v53, %v471_v26  ;;  %v174_v57 = vsub.f32 %v70_v54, %v471_v26 }
  0x8f   :  { %333 = vpow2.f32 %v245_v50  ;;  %v222_v58 = vmul.f32 -12.005, %v197_v52 }
  0x90   :  { %v253_v59 = vmul.f32 1.442695, %v223_v55  ;;  %v200_v60 = vmul.f32 %v175_v56, %v175_v56  ;;  %v199_v61 = vmul.f32 %v174_v57, %v174_v57 }
  0x91   :  { %v251_v62 = vmul.f32 1.442695, %v222_v58  ;;  %v85_v63 = vpop.permute.xlu1 %84  ;;  %v80_v0 = vpop.permute.xlu0 %79 }
  0x92   :  { %335 = vpow2.f32 %v253_v59  ;;  %v225_v1 = vmul.f32 -12.005, %v200_v60  ;;  %v224_v2 = vmul.f32 -12.005, %v199_v61  ;;  %v177_v3 = vsub.f32 %v85_v63, %v471_v26 }
  0x93   :  { %337 = vpow2.f32 %v251_v62  ;;  %v176_v4 = vsub.f32 %v80_v0, %v471_v26 }
  0x94   :  { %v328_v5 = vpop.eup %327  ;;  %v257_v6 = vmul.f32 1.442695, %v225_v1  ;;  %v255_v7 = vmul.f32 1.442695, %v224_v2  ;;  %v202_v8 = vmul.f32 %v177_v3, %v177_v3 }
  0x95   :  { %v330_v9 = vpop.eup %329  ;;  %296 = vst.msk [vmem:[%s600_s2 + $0x10] sm:$0xff] %vm293_vm0, %v328_v5  ;;  %v201_v10 = vmul.f32 %v176_v4, %v176_v4  ;;  %v95_v11 = vpop.permute.xlu1 %94 }
  0x96   :  { %v90_v12 = vpop.permute.xlu0 %89  ;;  %294 = vst.msk [vmem:[%s600_s2] sm:$0xff] %vm293_vm0, %v330_v9  ;;  %339 = vpow2.f32 %v257_v6  ;;  %v227_v13 = vmul.f32 -12.005, %v202_v8  ;;  %v179_v14 = vsub.f32 %v95_v11, %v471_v26 }
  0x97   :  { %v178_v15 = vsub.f32 %v90_v12, %v471_v26  ;;  %341 = vpow2.f32 %v255_v7  ;;  %v226_v16 = vmul.f32 -12.005, %v201_v10 }
  0x98   :  { %v332_v17 = vpop.eup %331  ;;  %v261_v18 = vmul.f32 1.442695, %v227_v13  ;;  %v204_v19 = vmul.f32 %v179_v14, %v179_v14 }
  0x99   :  { %v203_v20 = vmul.f32 %v178_v15, %v178_v15  ;;  %v334_v21 = vpop.eup %333  ;;  %297 = vst.msk [vmem:[%s600_s2 + $0x18] sm:$0xff] %vm293_vm0, %v332_v17  ;;  %v259_v22 = vmul.f32 1.442695, %v226_v16  ;;  %v105_v23 = vpop.permute.xlu1 %104 }
  0x9a   :  { %v100_v24 = vpop.permute.xlu0 %99  ;;  %295 = vst.msk [vmem:[%s600_s2 + $0x8] sm:$0xff] %vm293_vm0, %v334_v21  ;;  %343 = vpow2.f32 %v261_v18  ;;  %v229_v25 = vmul.f32 -12.005, %v204_v19  ;;  %v181_v28 = vsub.f32 %v105_v23, %v471_v26 }
  0x9b   :  { %v228_v27 = vmul.f32 -12.005, %v203_v20  ;;  %345 = vpow2.f32 %v259_v22  ;;  %v180_v29 = vsub.f32 %v100_v24, %v471_v26 }
  0x9c   :  { %v336_v30 = vpop.eup %335  ;;  %v265_v31 = vmul.f32 1.442695, %v229_v25  ;;  %v206_v33 = vmul.f32 %v181_v28, %v181_v28 }
  0x9d   :  { %v263_v32 = vmul.f32 1.442695, %v228_v27  ;;  %v338_v34 = vpop.eup %337  ;;  %299 = vst.msk [vmem:[%s600_s2 + $0x28] sm:$0xff] %vm293_vm0, %v336_v30  ;;  %v205_v35 = vmul.f32 %v180_v29, %v180_v29  ;;  %v115_v36 = vpop.permute.xlu1 %114 }
  0x9e   :  { %v110_v37 = vpop.permute.xlu0 %109  ;;  %298 = vst.msk [vmem:[%s600_s2 + $0x20] sm:$0xff] %vm293_vm0, %v338_v34  ;;  %347 = vpow2.f32 %v265_v31  ;;  %v231_v38 = vmul.f32 -12.005, %v206_v33  ;;  %v183_v39 = vsub.f32 %v115_v36, %v471_v26 }
  0x9f   :  { %v182_v40 = vsub.f32 %v110_v37, %v471_v26  ;;  %349 = vpow2.f32 %v263_v32  ;;  %v230_v41 = vmul.f32 -12.005, %v205_v35 }
  0xa0   :  { %v340_v42 = vpop.eup %339  ;;  %v269_v43 = vmul.f32 1.442695, %v231_v38  ;;  %v208_v44 = vmul.f32 %v183_v39, %v183_v39 }
  0xa1   :  { %v207_v45 = vmul.f32 %v182_v40, %v182_v40  ;;  %v342_v46 = vpop.eup %341  ;;  %301 = vst.msk [vmem:[%s600_s2 + $0x38] sm:$0xff] %vm293_vm0, %v340_v42  ;;  %v267_v47 = vmul.f32 1.442695, %v230_v41  ;;  %v125_v48 = vpop.permute.xlu1 %124 }
  0xa2   :  { %v120_v49 = vpop.permute.xlu0 %119  ;;  %300 = vst.msk [vmem:[%s600_s2 + $0x30] sm:$0xff] %vm293_vm0, %v342_v46  ;;  %351 = vpow2.f32 %v269_v43  ;;  %v233_v50 = vmul.f32 -12.005, %v208_v44  ;;  %v185_v52 = vsub.f32 %v125_v48, %v471_v26 }
  0xa3   :  { %v232_v51 = vmul.f32 -12.005, %v207_v45  ;;  %353 = vpow2.f32 %v267_v47  ;;  %v184_v53 = vsub.f32 %v120_v49, %v471_v26 }
  0xa4   :  { %v344_v54 = vpop.eup %343  ;;  %v273_v55 = vmul.f32 1.442695, %v233_v50  ;;  %v210_v57 = vmul.f32 %v185_v52, %v185_v52 }
  0xa5   :  { %v271_v56 = vmul.f32 1.442695, %v232_v51  ;;  %v346_v58 = vpop.eup %345  ;;  %303 = vst.msk [vmem:[%s600_s2 + $0x48] sm:$0xff] %vm293_vm0, %v344_v54  ;;  %v209_v59 = vmul.f32 %v184_v53, %v184_v53  ;;  %v135_v60 = vpop.permute.xlu1 %134 }
  0xa6   :  { %v130_v61 = vpop.permute.xlu0 %129  ;;  %302 = vst.msk [vmem:[%s600_s2 + $0x40] sm:$0xff] %vm293_vm0, %v346_v58  ;;  %355 = vpow2.f32 %v273_v55  ;;  %v235_v62 = vmul.f32 -12.005, %v210_v57  ;;  %v187_v63 = vsub.f32 %v135_v60, %v471_v26 }
  0xa7   :  { %v186_v0 = vsub.f32 %v130_v61, %v471_v26  ;;  %357 = vpow2.f32 %v271_v56  ;;  %v234_v1 = vmul.f32 -12.005, %v209_v59 }
  0xa8   :  { %v348_v2 = vpop.eup %347  ;;  %v277_v3 = vmul.f32 1.442695, %v235_v62  ;;  %v212_v4 = vmul.f32 %v187_v63, %v187_v63 }
  0xa9   :  { %v211_v5 = vmul.f32 %v186_v0, %v186_v0  ;;  %v350_v6 = vpop.eup %349  ;;  %305 = vst.msk [vmem:[%s600_s2 + $0x58] sm:$0xff] %vm293_vm0, %v348_v2  ;;  %v275_v7 = vmul.f32 1.442695, %v234_v1  ;;  %v145_v8 = vpop.permute.xlu1 %144 }
  0xaa   :  { %v140_v9 = vpop.permute.xlu0 %139  ;;  %304 = vst.msk [vmem:[%s600_s2 + $0x50] sm:$0xff] %vm293_vm0, %v350_v6  ;;  %359 = vpow2.f32 %v277_v3  ;;  %v237_v10 = vmul.f32 -12.005, %v212_v4  ;;  %v189_v12 = vsub.f32 %v145_v8, %v471_v26 }
  0xab   :  { %v236_v11 = vmul.f32 -12.005, %v211_v5  ;;  %361 = vpow2.f32 %v275_v7  ;;  %v188_v13 = vsub.f32 %v140_v9, %v471_v26 }
  0xac   :  { %v352_v14 = vpop.eup %351  ;;  %v281_v15 = vmul.f32 1.442695, %v237_v10  ;;  %v214_v17 = vmul.f32 %v189_v12, %v189_v12 }
  0xad   :  { %v279_v16 = vmul.f32 1.442695, %v236_v11  ;;  %v354_v18 = vpop.eup %353  ;;  %307 = vst.msk [vmem:[%s600_s2 + $0x68] sm:$0xff] %vm293_vm0, %v352_v14  ;;  %v213_v19 = vmul.f32 %v188_v13, %v188_v13  ;;  %v155_v20 = vpop.permute.xlu1 %154 }
  0xae   :  { %v150_v21 = vpop.permute.xlu0 %149  ;;  %306 = vst.msk [vmem:[%s600_s2 + $0x60] sm:$0xff] %vm293_vm0, %v354_v18  ;;  %363 = vpow2.f32 %v281_v15  ;;  %v239_v22 = vmul.f32 -12.005, %v214_v17  ;;  %v191_v23 = vsub.f32 %v155_v20, %v471_v26 }
  0xaf   :  { %v190_v24 = vsub.f32 %v150_v21, %v471_v26  ;;  %365 = vpow2.f32 %v279_v16  ;;  %v238_v25 = vmul.f32 -12.005, %v213_v19 }
  0xb0   :  { %v356_v27 = vpop.eup %355  ;;  %v285_v28 = vmul.f32 1.442695, %v239_v22  ;;  %v216_v29 = vmul.f32 %v191_v23, %v191_v23 }
  0xb1   :  { %v215_v30 = vmul.f32 %v190_v24, %v190_v24  ;;  %v358_v31 = vpop.eup %357  ;;  %309 = vst.msk [vmem:[%s600_s2 + $0x78] sm:$0xff] %vm293_vm0, %v356_v27  ;;  %v283_v32 = vmul.f32 1.442695, %v238_v25 }
  0xb2   :  { %v160_v33 = vpop.permute.xlu0 %159  ;;  %308 = vst.msk [vmem:[%s600_s2 + $0x70] sm:$0xff] %vm293_vm0, %v358_v31  ;;  %367 = vpow2.f32 %v285_v28  ;;  %v241_v34 = vmul.f32 -12.005, %v216_v29 }
  0xb3   :  { %v240_v35 = vmul.f32 -12.005, %v215_v30  ;;  %v192_v36 = vsub.f32 %v160_v33, %v471_v26  ;;  %369 = vpow2.f32 %v283_v32 }
  0xb4   :  { %v360_v37 = vpop.eup %359  ;;  %v289_v38 = vmul.f32 1.442695, %v241_v34 }
  0xb5   :  { %v287_v39 = vmul.f32 1.442695, %v240_v35  ;;  %v217_v40 = vmul.f32 %v192_v36, %v192_v36  ;;  %v362_v41 = vpop.eup %361  ;;  %311 = vst.msk [vmem:[%s600_s2 + $0x88] sm:$0xff] %vm293_vm0, %v360_v37 }
  0xb6   :  { %310 = vst.msk [vmem:[%s600_s2 + $0x80] sm:$0xff] %vm293_vm0, %v362_v41  ;;  %371 = vpow2.f32 %v289_v38 }
  0xb7   :  { %v242_v42 = vmul.f32 -12.005, %v217_v40  ;;  %373 = vpow2.f32 %v287_v39 }
  0xb8   :  { %v364_v26 = vpop.eup %363 }
  0xb9   :  { %v291_v43 = vmul.f32 1.442695, %v242_v42  ;;  %v366_v44 = vpop.eup %365  ;;  %313 = vst.msk [vmem:[%s600_s2 + $0x98] sm:$0xff] %vm293_vm0, %v364_v26 }
  0xba   :  { %312 = vst.msk [vmem:[%s600_s2 + $0x90] sm:$0xff] %vm293_vm0, %v366_v44 }
  0xbb   :  { %375 = vpow2.f32 %v291_v43 }
  0xbc   :  { %v368_v45 = vpop.eup %367 }
  0xbd   :  { %v370_v46 = vpop.eup %369  ;;  %315 = vst.msk [vmem:[%s600_s2 + $0xa8] sm:$0xff] %vm293_vm0, %v368_v45 }
  0xbe   :  { %314 = vst.msk [vmem:[%s600_s2 + $0xa0] sm:$0xff] %vm293_vm0, %v370_v46 }
  0xc0   :  { %v372_v47 = vpop.eup %371 }
  0xc1   :  { %v374_v48 = vpop.eup %373  ;;  %317 = vst.msk [vmem:[%s600_s2 + $0xb8] sm:$0xff] %vm293_vm0, %v372_v47 }
  0xc2   :  { %316 = vst.msk [vmem:[%s600_s2 + $0xb0] sm:$0xff] %vm293_vm0, %v374_v48 }
  0xc5   :  { %v376_v49 = vpop.eup %375 }
  0xc6   :  { %318 = vst.msk [vmem:[%s600_s2 + $0xc0] sm:$0xff] %vm293_vm0, %v376_v49 }

</bundles_post_ra>
